<compile_context>
chip_gen: v7x
topology: tpu7x:2x2x1
jax: 0.10.0
libtpu: 0.0.40
codegen_flags: <defaults>
</compile_context>

<pallas_src>
import functools

import jax
import jax.numpy as jnp
from jax.experimental import pallas as pl
from jax.experimental.pallas import tpu as pltpu


def _round_up(x: int, m: int) -> int:
    return ((x + m - 1) // m) * m


def _nce_loss_kernel(pos_ref, neg_ref, out_ref, m_sc, s_sc, sp_sc, *,
                     B, N, P, has_row_tail, has_col_tail):
    i = pl.program_id(0)           # batch-tile index   ("parallel")
    k = pl.program_id(1)           # neg-tile index     ("arbitrary", last)
    nk = pl.num_programs(1)

    TB = m_sc.shape[0]
    TN = neg_ref.shape[1]

    # --- init running (m, s) and sum(pos) from the positives, once per tile --
    @pl.when(k == 0)
    def _init():
        pos = pos_ref[...].astype(jnp.float32)                    # (TB, P)
        m0 = jnp.max(pos, axis=1, keepdims=True)                  # (TB, 1)
        s0 = jnp.sum(jnp.exp(pos - m0), axis=1, keepdims=True)    # (TB, 1)
        m_sc[...] = m0
        s_sc[...] = s0
        sp_sc[...] = jnp.sum(pos, axis=1, keepdims=True)          # (TB, 1)

    # Single unconditional load of this neg tile (the dominant HBM stream).
    neg = neg_ref[...].astype(jnp.float32)                        # (TB, TN)

    def _update(col_valid):
        # Online logsumexp update over this neg tile. col_valid is either
        # None (fully valid tile, unmasked fast path) or a (TB, TN) bool mask.
        if col_valid is None:
            m_tile = jnp.max(neg, axis=1, keepdims=True)          # (TB, 1)
        else:
            m_tile = jnp.max(jnp.where(col_valid, neg, -jnp.inf),
                             axis=1, keepdims=True)
        m_prev = m_sc[...]
        m_new = jnp.maximum(m_prev, m_tile)
        p = jnp.exp(neg - m_new)                                  # (TB, TN)
        if col_valid is not None:
            # NOTE: keep this as a select; multiply-by-mask would propagate
            # inf/NaN from padded garbage columns.
            p = jnp.where(col_valid, p, 0.0)
        s_sc[...] = jnp.exp(m_prev - m_new) * s_sc[...] + jnp.sum(
            p, axis=1, keepdims=True)
        m_sc[...] = m_new

    if has_col_tail:
        # Only the last neg tile can contain padded columns.
        @pl.when(k == nk - 1)
        def _masked():
            col_valid = (jax.lax.broadcasted_iota(jnp.int32, (TB, TN), 1)
                         + k * TN) < N
            _update(col_valid)

        @pl.when(k != nk - 1)
        def _unmasked():
            _update(None)
    else:
        _update(None)

    # --- finalize: per-batch-tile partial sum of (P*lse - sum_p pos) ---------
    @pl.when(k == nk - 1)
    def _finalize():
        lse = m_sc[...] + jnp.log(s_sc[...])                      # (TB, 1)
        contrib = float(P) * lse - sp_sc[...]                     # (TB, 1)
        if has_row_tail:
            row_valid = (jax.lax.broadcasted_iota(jnp.int32, (TB, 1), 0)
                         + i * TB) < B
            contrib = jnp.where(row_valid, contrib, 0.0)
        tile_sum = jnp.sum(contrib, axis=0, keepdims=True)        # (1, 1)
        out_ref[...] = jnp.broadcast_to(
            tile_sum.reshape(1, 1, 1), out_ref.shape).astype(jnp.float32)


def modified_nce_softmax_loss(pos_sim: jax.Array, neg_sim: jax.Array,
                              *, block_b: int = 512,
                              block_n: int = 4096,
                              vmem_budget_bytes: int = 48 * 1024 * 1024
                              ) -> jax.Array:
    """pos_sim: (B, P), neg_sim: (B, N) -> scalar f32 loss."""
    B, P = pos_sim.shape
    Bn, N = neg_sim.shape
    assert B == Bn, "batch dims must match"

    pos_isz = jnp.dtype(pos_sim.dtype).itemsize
    neg_isz = jnp.dtype(neg_sim.dtype).itemsize
    # Sublane tile multiple depends on dtype packing: 8 (f32), 16 (bf16), 32 (8-bit).
    row_mult = 32 // min(pos_isz, neg_isz)

    # --- tile selection ------------------------------------------------------
    B_pad = _round_up(B, row_mult)
    TB = min(_round_up(block_b, row_mult), B_pad)
    # Guarantee >= 2 batch tiles whenever B allows it (v7x dual-TC megacore).
    if B > row_mult:
        TB = min(TB, _round_up(pl.cdiv(B, 2), row_mult))
    TB = max(TB, row_mult)

    N_pad = _round_up(N, 128)
    TN = min(_round_up(block_n, 128), N_pad)

    # --- VMEM budget (double-buffered inputs/outputs + scratch) --------------
    def _vmem_usage(tb, tn):
        neg_bytes = 2 * tb * tn * neg_isz          # neg stream, 2 buffers
        pos_bytes = 2 * tb * P * pos_isz           # pos block, 2 buffers
        out_bytes = 2 * 8 * 128 * 4                # lane-dense partials
        scr_bytes = 3 * tb * 4                     # m, s, sum_pos scratch
        return neg_bytes + pos_bytes + out_bytes + scr_bytes

    while _vmem_usage(TB, TN) > vmem_budget_bytes and TN > 128:
        TN = max(128, _round_up(TN // 2, 128))
    while _vmem_usage(TB, TN) > vmem_budget_bytes and TB > row_mult:
        TB = max(row_mult, _round_up(TB // 2, row_mult))

    nb = pl.cdiv(B, TB)
    nk = pl.cdiv(N, TN)

    # Limit derived from actual usage (+ headroom), capped at the v7x-safe
    # budget so the same config never over-subscribes 64 MiB VMEM.
    vmem_limit = int(min(max(_vmem_usage(TB, TN) + (4 << 20), 32 << 20),
                         vmem_budget_bytes))

    has_row_tail = (B % TB) != 0
    has_col_tail = (N % TN) != 0

    partials = pl.pallas_call(
        functools.partial(_nce_loss_kernel, B=B, N=N, P=P,
                          has_row_tail=has_row_tail,
                          has_col_tail=has_col_tail),
        out_shape=jax.ShapeDtypeStruct((nb, 8, 128), jnp.float32),
        grid_spec=pltpu.PrefetchScalarGridSpec(
            num_scalar_prefetch=0,
            grid=(nb, nk),
            in_specs=[
                # pos: constant block index along k -> fetched once per batch tile
                pl.BlockSpec((TB, P), lambda i, k: (i, 0)),
                # neg: the dominant, pipelined HBM stream
                pl.BlockSpec((TB, TN), lambda i, k: (i, k)),
            ],
            # one lane-dense partial-sum block per batch tile
            out_specs=pl.BlockSpec((1, 8, 128), lambda i, k: (i, 0, 0)),
            scratch_shapes=[
                pltpu.VMEM((TB, 1), jnp.float32),   # running max  m
                pltpu.VMEM((TB, 1), jnp.float32),   # running sum  s
                pltpu.VMEM((TB, 1), jnp.float32),   # sum over positives
            ],
        ),
        compiler_params=pltpu.CompilerParams(
            dimension_semantics=("parallel", "arbitrary"),
            vmem_limit_bytes=vmem_limit,
        ),
    )(pos_sim, neg_sim)

    # Finish the mean in the wrapper with the true (unpadded) divisor B*P.
    return jnp.sum(partials[:, 0, 0]) / (B * P)


if __name__ == "__main__":
    key = jax.random.PRNGKey(0)
    k_pos, k_neg = jax.random.split(key)

    # Small shapes consistent with the module (batch, P positives, N negatives).
    B, P, N = 12, 4, 300
    pos_sim = jax.random.normal(k_pos, (B, P), dtype=jnp.float32)
    neg_sim = jax.random.normal(k_neg, (B, N), dtype=jnp.float32)

    # Pure-JAX reference (same math as the PyTorch module).
    sim = jnp.concatenate([pos_sim, neg_sim], axis=1)
    ref = -jnp.mean(jax.nn.log_softmax(sim, axis=1)[:, :P])

    # Small blocks: exercises the (parallel, arbitrary) grid, the online
    # logsumexp across several neg tiles, the masked-last-tile path, and the
    # row-tail masking in finalize.
    loss_tiled = modified_nce_softmax_loss(pos_sim, neg_sim,
                                           block_b=8, block_n=128)
    # Default (production) block sizes -> single padded tile at this toy size.
    loss_default = modified_nce_softmax_loss(pos_sim, neg_sim)

    # bf16 inputs: exercises the dtype-aware sublane rounding (row_mult=16);
    # HBM traffic is halved while accumulation stays f32 inside the kernel.
    pos_bf16 = pos_sim.astype(jnp.bfloat16)
    neg_bf16 = neg_sim.astype(jnp.bfloat16)
    loss_bf16 = modified_nce_softmax_loss(pos_bf16, neg_bf16,
                                          block_b=8, block_n=128)
    sim_bf = jnp.concatenate([pos_bf16.astype(jnp.float32),
                              neg_bf16.astype(jnp.float32)], axis=1)
    ref_bf16 = -jnp.mean(jax.nn.log_softmax(sim_bf, axis=1)[:, :P])

    jax.block_until_ready((loss_tiled, loss_default, loss_bf16))

    assert jnp.allclose(loss_tiled, ref, atol=1e-5, rtol=1e-5), (loss_tiled, ref)
    assert jnp.allclose(loss_default, ref, atol=1e-5, rtol=1e-5), (loss_default, ref)
    assert jnp.allclose(loss_bf16, ref_bf16, atol=3e-2, rtol=3e-2), (loss_bf16, ref_bf16)
    print("KERNEL_OK")
</pallas_src>

<mosaic_0001>
module attributes {stable_mosaic.version = 11 : i64} {
  func.func @_nce_loss_kernel(%arg0: i32, %arg1: i32, %arg2: memref<8x4xf32, #tpu.memory_space<vmem>>, %arg3: memref<8x128xf32, #tpu.memory_space<vmem>>, %arg4: memref<1x8x128xf32, #tpu.memory_space<vmem>>, %arg5: memref<8x1xf32, #tpu.memory_space<vmem>>, %arg6: memref<8x1xf32, #tpu.memory_space<vmem>>, %arg7: memref<8x1xf32, #tpu.memory_space<vmem>>) attributes {dimension_semantics = [#tpu.dimension_semantics<parallel>, #tpu.dimension_semantics<arbitrary>], iteration_bounds = array<i64: 2, 3>, scalar_prefetch = 0 : i64, scratch_operands = 3 : i64, tpu.core_type = #tpu.core_type<tc>, window_params = [{transform_indices = @transform_0, window_bounds = array<i64: 8, 4>}, {transform_indices = @transform_1, window_bounds = array<i64: 8, 128>}, {transform_indices = @transform_2, window_bounds = array<i64: 1, 8, 128>}]} {
    %c0_i32 = arith.constant 0 : i32
    %0 = arith.cmpi eq, %arg1, %c0_i32 : i32
    %1 = arith.extui %0 : i1 to i32
    %c0_i32_0 = arith.constant 0 : i32
    %2 = arith.cmpi ne, %1, %c0_i32_0 : i32
    scf.if %2 {
      %c0_7 = arith.constant 0 : index
      %c0_8 = arith.constant 0 : index
      %13 = vector.load %arg2[%c0_7, %c0_8] : memref<8x4xf32, #tpu.memory_space<vmem>>, vector<8x4xf32>
      %cst = arith.constant dense<0xFF800000> : vector<8xf32>
      %14 = vector.multi_reduction <maximumf>, %13, %cst [1] : vector<8x4xf32> to vector<8xf32>
      %15 = vector.shape_cast %14 : vector<8xf32> to vector<8x1xf32>
      %16 = vector.broadcast %15 : vector<8x1xf32> to vector<8x4xf32>
      %17 = arith.subf %13, %16 : vector<8x4xf32>
      %18 = math.exp %17 : vector<8x4xf32>
      %cst_9 = arith.constant dense<0.000000e+00> : vector<8xf32>
      %19 = vector.multi_reduction <add>, %18, %cst_9 [1] : vector<8x4xf32> to vector<8xf32>
      %20 = vector.shape_cast %19 : vector<8xf32> to vector<8x1xf32>
      %c0_10 = arith.constant 0 : index
      %c0_11 = arith.constant 0 : index
      %21 = vector.load %arg5[%c0_10, %c0_11] : memref<8x1xf32, #tpu.memory_space<vmem>>, vector<8x1xf32>
      tpu.vector_store %arg5[%c0_10, %c0_11], %15 {strides = array<i32>} : memref<8x1xf32, #tpu.memory_space<vmem>>, vector<8x1xf32>,
      %c0_12 = arith.constant 0 : index
      %c0_13 = arith.constant 0 : index
      %22 = vector.load %arg6[%c0_12, %c0_13] : memref<8x1xf32, #tpu.memory_space<vmem>>, vector<8x1xf32>
      tpu.vector_store %arg6[%c0_12, %c0_13], %20 {strides = array<i32>} : memref<8x1xf32, #tpu.memory_space<vmem>>, vector<8x1xf32>,
      %cst_14 = arith.constant dense<0.000000e+00> : vector<8xf32>
      %23 = vector.multi_reduction <add>, %13, %cst_14 [1] : vector<8x4xf32> to vector<8xf32>
      %24 = vector.shape_cast %23 : vector<8xf32> to vector<8x1xf32>
      %c0_15 = arith.constant 0 : index
      %c0_16 = arith.constant 0 : index
      %25 = vector.load %arg7[%c0_15, %c0_16] : memref<8x1xf32, #tpu.memory_space<vmem>>, vector<8x1xf32>
      tpu.vector_store %arg7[%c0_15, %c0_16], %24 {strides = array<i32>} : memref<8x1xf32, #tpu.memory_space<vmem>>, vector<8x1xf32>,
    } else {
    }
    %c0 = arith.constant 0 : index
    %c0_1 = arith.constant 0 : index
    %3 = vector.load %arg3[%c0, %c0_1] : memref<8x128xf32, #tpu.memory_space<vmem>>, vector<8x128xf32>
    %c2_i32 = arith.constant 2 : i32
    %4 = arith.cmpi eq, %arg1, %c2_i32 : i32
    %5 = arith.extui %4 : i1 to i32
    %c0_i32_2 = arith.constant 0 : i32
    %6 = arith.cmpi ne, %5, %c0_i32_2 : i32
    scf.if %6 {
      %13 = tpu.iota {dimensions = array<i32: 1>} : vector<8x128xi32>
      %c128_i32 = arith.constant 128 : i32
      %14 = arith.muli %arg1, %c128_i32 : i32
      %15 = vector.broadcast %14 : i32 to vector<8x128xi32>
      %16 = arith.addi %13, %15 : vector<8x128xi32>
      %c300_i32 = arith.constant 300 : i32
      %17 = vector.broadcast %c300_i32 : i32 to vector<8x128xi32>
      %18 = arith.cmpi slt, %16, %17 : vector<8x128xi32>
      %cst = arith.constant 0xFF800000 : f32
      %19 = vector.broadcast %cst : f32 to vector<8x128xf32>
      %20 = arith.select %18, %3, %19 : vector<8x128xi1>, vector<8x128xf32>
      %cst_7 = arith.constant dense<0xFF800000> : vector<8xf32>
      %21 = vector.multi_reduction <maximumf>, %20, %cst_7 [1] : vector<8x128xf32> to vector<8xf32>
      %22 = vector.shape_cast %21 : vector<8xf32> to vector<8x1xf32>
      %c0_8 = arith.constant 0 : index
      %c0_9 = arith.constant 0 : index
      %23 = vector.load %arg5[%c0_8, %c0_9] : memref<8x1xf32, #tpu.memory_space<vmem>>, vector<8x1xf32>
      %24 = arith.maximumf %23, %22 : vector<8x1xf32>
      %25 = vector.broadcast %24 : vector<8x1xf32> to vector<8x128xf32>
      %26 = arith.subf %3, %25 : vector<8x128xf32>
      %27 = math.exp %26 : vector<8x128xf32>
      %cst_10 = arith.constant 0.000000e+00 : f32
      %28 = vector.broadcast %cst_10 : f32 to vector<8x128xf32>
      %29 = arith.select %18, %27, %28 : vector<8x128xi1>, vector<8x128xf32>
      %30 = arith.subf %23, %24 : vector<8x1xf32>
      %31 = math.exp %30 : vector<8x1xf32>
      %c0_11 = arith.constant 0 : index
      %c0_12 = arith.constant 0 : index
      %32 = vector.load %arg6[%c0_11, %c0_12] : memref<8x1xf32, #tpu.memory_space<vmem>>, vector<8x1xf32>
      %33 = arith.mulf %31, %32 : vector<8x1xf32>
      %cst_13 = arith.constant dense<0.000000e+00> : vector<8xf32>
      %34 = vector.multi_reduction <add>, %29, %cst_13 [1] : vector<8x128xf32> to vector<8xf32>
      %35 = vector.shape_cast %34 : vector<8xf32> to vector<8x1xf32>
      %36 = arith.addf %33, %35 : vector<8x1xf32>
      %c0_14 = arith.constant 0 : index
      %c0_15 = arith.constant 0 : index
      %37 = vector.load %arg6[%c0_14, %c0_15] : memref<8x1xf32, #tpu.memory_space<vmem>>, vector<8x1xf32>
      tpu.vector_store %arg6[%c0_14, %c0_15], %36 {strides = array<i32>} : memref<8x1xf32, #tpu.memory_space<vmem>>, vector<8x1xf32>,
      %c0_16 = arith.constant 0 : index
      %c0_17 = arith.constant 0 : index
      %38 = vector.load %arg5[%c0_16, %c0_17] : memref<8x1xf32, #tpu.memory_space<vmem>>, vector<8x1xf32>
      tpu.vector_store %arg5[%c0_16, %c0_17], %24 {strides = array<i32>} : memref<8x1xf32, #tpu.memory_space<vmem>>, vector<8x1xf32>,
    } else {
    }
    %c2_i32_3 = arith.constant 2 : i32
    %7 = arith.cmpi ne, %arg1, %c2_i32_3 : i32
    %8 = arith.extui %7 : i1 to i32
    %c0_i32_4 = arith.constant 0 : i32
    %9 = arith.cmpi ne, %8, %c0_i32_4 : i32
    scf.if %9 {
      %cst = arith.constant dense<0xFF800000> : vector<8xf32>
      %13 = vector.multi_reduction <maximumf>, %3, %cst [1] : vector<8x128xf32> to vector<8xf32>
      %14 = vector.shape_cast %13 : vector<8xf32> to vector<8x1xf32>
      %c0_7 = arith.constant 0 : index
      %c0_8 = arith.constant 0 : index
      %15 = vector.load %arg5[%c0_7, %c0_8] : memref<8x1xf32, #tpu.memory_space<vmem>>, vector<8x1xf32>
      %16 = arith.maximumf %15, %14 : vector<8x1xf32>
      %17 = vector.broadcast %16 : vector<8x1xf32> to vector<8x128xf32>
      %18 = arith.subf %3, %17 : vector<8x128xf32>
      %19 = math.exp %18 : vector<8x128xf32>
      %20 = arith.subf %15, %16 : vector<8x1xf32>
      %21 = math.exp %20 : vector<8x1xf32>
      %c0_9 = arith.constant 0 : index
      %c0_10 = arith.constant 0 : index
      %22 = vector.load %arg6[%c0_9, %c0_10] : memref<8x1xf32, #tpu.memory_space<vmem>>, vector<8x1xf32>
      %23 = arith.mulf %21, %22 : vector<8x1xf32>
      %cst_11 = arith.constant dense<0.000000e+00> : vector<8xf32>
      %24 = vector.multi_reduction <add>, %19, %cst_11 [1] : vector<8x128xf32> to vector<8xf32>
      %25 = vector.shape_cast %24 : vector<8xf32> to vector<8x1xf32>
      %26 = arith.addf %23, %25 : vector<8x1xf32>
      %c0_12 = arith.constant 0 : index
      %c0_13 = arith.constant 0 : index
      %27 = vector.load %arg6[%c0_12, %c0_13] : memref<8x1xf32, #tpu.memory_space<vmem>>, vector<8x1xf32>
      tpu.vector_store %arg6[%c0_12, %c0_13], %26 {strides = array<i32>} : memref<8x1xf32, #tpu.memory_space<vmem>>, vector<8x1xf32>,
      %c0_14 = arith.constant 0 : index
      %c0_15 = arith.constant 0 : index
      %28 = vector.load %arg5[%c0_14, %c0_15] : memref<8x1xf32, #tpu.memory_space<vmem>>, vector<8x1xf32>
      tpu.vector_store %arg5[%c0_14, %c0_15], %16 {strides = array<i32>} : memref<8x1xf32, #tpu.memory_space<vmem>>, vector<8x1xf32>,
    } else {
    }
    %c2_i32_5 = arith.constant 2 : i32
    %10 = arith.cmpi eq, %arg1, %c2_i32_5 : i32
    %11 = arith.extui %10 : i1 to i32
    %c0_i32_6 = arith.constant 0 : i32
    %12 = arith.cmpi ne, %11, %c0_i32_6 : i32
    scf.if %12 {
      %c0_7 = arith.constant 0 : index
      %c0_8 = arith.constant 0 : index
      %13 = vector.load %arg5[%c0_7, %c0_8] : memref<8x1xf32, #tpu.memory_space<vmem>>, vector<8x1xf32>
      %c0_9 = arith.constant 0 : index
      %c0_10 = arith.constant 0 : index
      %14 = vector.load %arg6[%c0_9, %c0_10] : memref<8x1xf32, #tpu.memory_space<vmem>>, vector<8x1xf32>
      %15 = math.log %14 : vector<8x1xf32>
      %16 = arith.addf %13, %15 : vector<8x1xf32>
      %cst = arith.constant 4.000000e+00 : f32
      %17 = vector.broadcast %cst : f32 to vector<8x1xf32>
      %18 = arith.mulf %17, %16 : vector<8x1xf32>
      %c0_11 = arith.constant 0 : index
      %c0_12 = arith.constant 0 : index
      %19 = vector.load %arg7[%c0_11, %c0_12] : memref<8x1xf32, #tpu.memory_space<vmem>>, vector<8x1xf32>
      %20 = arith.subf %18, %19 : vector<8x1xf32>
      %21 = tpu.iota {dimensions = array<i32: 0>} : vector<8x1xi32>
      %c8_i32 = arith.constant 8 : i32
      %22 = arith.muli %arg0, %c8_i32 : i32
      %23 = vector.broadcast %22 : i32 to vector<8x1xi32>
      %24 = arith.addi %21, %23 : vector<8x1xi32>
      %c12_i32 = arith.constant 12 : i32
      %25 = vector.broadcast %c12_i32 : i32 to vector<8x1xi32>
      %26 = arith.cmpi slt, %24, %25 : vector<8x1xi32>
      %cst_13 = arith.constant 0.000000e+00 : f32
      %27 = vector.broadcast %cst_13 : f32 to vector<8x1xf32>
      %28 = arith.select %26, %20, %27 : vector<8x1xi1>, vector<8x1xf32>
      %cst_14 = arith.constant dense<0.000000e+00> : vector<1xf32>
      %29 = vector.multi_reduction <add>, %28, %cst_14 [0] : vector<8x1xf32> to vector<1xf32>
      %30 = vector.shape_cast %29 : vector<1xf32> to vector<1x1xf32>
      %31 = vector.shape_cast %30 : vector<1x1xf32> to vector<1x1x1xf32>
      %32 = vector.shape_cast %31 : vector<1x1x1xf32> to vector<1x1x1xf32>
      %33 = vector.broadcast %32 : vector<1x1x1xf32> to vector<1x8x128xf32>
      %c0_15 = arith.constant 0 : index
      %c0_16 = arith.constant 0 : index
      %c0_17 = arith.constant 0 : index
      %34 = vector.load %arg4[%c0_15, %c0_16, %c0_17] : memref<1x8x128xf32, #tpu.memory_space<vmem>>, vector<1x8x128xf32>
      tpu.vector_store %arg4[%c0_15, %c0_16, %c0_17], %33 {strides = array<i32>} : memref<1x8x128xf32, #tpu.memory_space<vmem>>, vector<1x8x128xf32>,
    } else {
    }
    return
  }
  func.func @transform_0(%arg0: i32, %arg1: i32) -> (i32, i32) {
    %c0_i32 = arith.constant 0 : i32
    %c0_i32_0 = arith.constant 0 : i32
    return %arg0, %c0_i32 : i32, i32
  }
  func.func @transform_1(%arg0: i32, %arg1: i32) -> (i32, i32) {
    %c0_i32 = arith.constant 0 : i32
    return %arg0, %arg1 : i32, i32
  }
  func.func @transform_2(%arg0: i32, %arg1: i32) -> (i32, i32, i32) {
    %c0_i32 = arith.constant 0 : i32
    %c0_i32_0 = arith.constant 0 : i32
    %c0_i32_1 = arith.constant 0 : i32
    return %arg0, %c0_i32, %c0_i32_0 : i32, i32, i32
  }
}

</mosaic_0001>

<bundles_post_ra>
// kernel: tpu_custom_call.1
= control target key start
LH: loop header
LB: loop body
LE: loop exit
PB: predicated region body
PF: predicated region fallthrough
CT: control target
= control target key end

     0   :  { %7 = vsyncpa [#allocation6], 0  ;;  %s979_s0 = inlined_call_operand.vmem [shape: f32[12,4], index: 0, kind: input, shape index: {}]   ;;  %s980_s1 = inlined_call_operand.hbm [shape: f32[12,300], index: 1, kind: input, shape index: {}]   ;;  %s981_s2 = inlined_call_operand.hbm [shape: f32[2,8,128], index: 2, kind: output, shape index: {}]  }
   0x1   :  { %9 = vsyncpa [#allocation6 + $0x1], 0 }
   0x2   :  { %10 = vsyncpa [#allocation7], 0 }
   0x3   :  { %12 = vsyncpa [#allocation7 + $0x1], 0  ;;  %s733_s9 = smov 0   ;;  %s735_s10 = smov 0  }
   0x4   :  { %s737_s11 = smov 0   ;;  %s739_s12 = smov 0  }
   0x5   :  { %s741_s13 = smov 0   ;;  %s743_s14 = smov 0  }
   0x6   :  { %s745_s15 = smov 0   ;;  %s747_s16 = smov 0  }
   0x7   :  { %s749_s17 = smov 0   ;;  %s751_s18 = smov 0  }
   0x8   :  { %s753_s19 = smov 0  }
   0x9 LB: > { %s418_s20 = sadd.s32 4294967295, %s711_s19   ;;  %s419_s21 = sadd.s32 4294967294, %s711_s19   ;;  %s711_s19 = sphi %s753_s19, %s18_s19   ;;  %s707_s18 = sphi %s751_s18, %s1003_s18   ;;  %s703_s17 = sphi %s749_s17, %s1002_s17   ;;  %s699_s16 = sphi %s747_s16, %s1001_s16   ;;  %s695_s15 = sphi %s745_s15, %s1000_s15   ;;  %s691_s14 = sphi %s743_s14, %s999_s14   ;;  %s687_s13 = sphi %s741_s13, %s998_s13   ;;  %s683_s12 = sphi %s739_s12, %s997_s12   ;;  %s679_s11 = sphi %s737_s11, %s996_s11   ;;  %s675_s10 = sphi %s735_s10, %s995_s10   ;;  %s671_s9 = sphi %s733_s9, %s994_s9  }
   0xa   : > { %s27_s22 = sadd.s32 1, %s703_s17  ;;  %s30_s23 = sadd.s32 1, %s707_s18 }
   0xb   : > { %p28_p0 = scmp.ge.s32.totalorder %s27_s22, 3  ;;  %s65_s24 = sadd.s32 1, %s691_s14 }
   0xc   : > { %p72_p1 = scmp.ne.s32.totalorder %s691_s14, %s687_s13  ;;  %p73_p2 = scmp.eq.s32.totalorder %s711_s19, 0 }
   0xd   : > { %s1005_s22 = smov (%p28_p0, %s27_s22), 0  ;;  %s1007_s23 = smov (!%p28_p0, %s30_s23), %s707_s18 }
   0xe   : > { %s61_s25 = ssub.s32 %s703_s17, %s1005_s22  ;;  %p799_p3 = por %p73_p2, %p72_p1 }
   0xf   : > { %p32_p4 = scmp.ge.s32.totalorder %s1007_s23, 2  ;;  %p78_p5 = scmp.ne.s32.totalorder %s687_s13, %s683_s12 }
  0x10   : > { %p79_p6 = scmp.eq.s32.totalorder %s418_s20, 0  ;;  %s91_s27 = sadd.s32 1, %s679_s11 }
  0x11   : > { %s1009_s23 = smov (%p32_p4, %s1007_s23), 0  ;;  %p101_p8 = scmp.ne.s32.totalorder %s679_s11, %s675_s10 }
  0x12   : > { %985 = sst [smem:[#allocation11_spill]] %s1009_s23  ;;  %p807_p7 = por %p79_p6, %p78_p5 }
  0x13   : > { %s60_s29 = ssub.s32 %s707_s18, %s1009_s23  ;;  %p102_p9 = scmp.eq.s32.totalorder %s418_s20, 5 }
  0x14   : > { %s62_s30 = sor.u32 %s61_s25, %s60_s29  ;;  %p89_p10 = scmp.eq.s32.totalorder %s60_s29, 0 }
  0x15   : > { %p63_p11 = scmp.eq.s32.totalorder %s62_s30, 0  ;;  %p815_p12 = por %p102_p9, %p101_p8 }
  0x16   : > { %s820_s4 = scalar_select %p89_p10, %s679_s11, %s91_s27  }
  0x17   : > { %s987_s3 = scalar_select %p815_p12, 1, 0 }
  0x18   : > { %s823_s5 = scalar_select %p63_p11, %s691_s14, %s65_s24  }
  0x19   : > { %p107_p13 = scmp.ne.s32.totalorder %s675_s10, %s671_s9  ;;  %p108_p0 = scmp.eq.s32.totalorder %s419_s21, 5 }
  0x1a   : > { %p451_p1 = scmp.lt.s32.totalorder %s711_s19, 6  ;;  %s135_s7 = sand.u32 1, %s691_s14  }
  0x1b   : > { %p828_p2 = por %p108_p0, %p107_p13  ;;  %s422_s8 = sshll.u32 %s135_s7, 3 }
  0x1c   : > { %s438_s12 = smul.u32 3, %s707_s18  ;;  %s139_s20 = scalar_lea.vmem [#allocation5], %s422_s8 }
  0x1d   : > { %s988_s6 = scalar_select %p828_p2, 1, 0 }
  0x1e   : > { %s148_s25 = sshll.u32 %s139_s20, 4  ;;  %p836_p4 = pnand %p451_p1, %p799_p3  ;;  %s841_s25 = int_to_ptr.vmem [resolvable:$true] %s148_s25 }
  0x1f   : > { %s144_s24 = sadd.s32 %s703_s17, %s438_s12  ;;  %s136_s26 = scalar_lea.sflag [#allocation6], %s135_s7 }
  0x20   : > { %s423_s21 = sshll.u32 %s144_s24, 7  ;;  %p561_p6 = pneg %p836_p4 }
  0x21   : > { %s846_s23 = scalar_lea.hbm %s980_s1, %s423_s21  ;;  %s564_s24 = scalar_lea.hbm %s980_s1, 768 }
  0x22   : > { %s559_s8 = scalar_lea.hbm %s846_s23, 128  ;;  %p565_p10 = scmp.lt.u32.totalorder %s846_s23, %s980_s1 }
  0x23   : > { %p560_p3 = scmp.ne.s32.totalorder %s846_s23, %s559_s8  ;;  %p566_p11 = scmp.lt.u32.totalorder %s564_s24, %s559_s8 }
  0x24   : > { %p568_p0 = scmp.lt.u32.totalorder %s559_s8, %s846_s23 }
  0x25   : > { %p562_p8 = pnand %p561_p6, %p560_p3  ;;  %p567_p13 = por %p566_p11, %p565_p10 }
  0x27   : > { %p563_p9 = pneg %p562_p8  ;;  %p569_p1 = por %p568_p0, %p567_p13 }
  0x29   : > { %p570_p5 = pnand %p569_p1, %p563_p9 }
  0x2b   : > { %573 = shalt.err (!%p570_p5)
}
  0x2c   : > { %s574_s7 = scalar_lea.vmem %s841_s25, 128  ;;  %s713_s30 = smov [#allocation5]  }
  0x2d   : > { %p575_p3 = scmp.ne.s32.totalorder %s841_s25, %s574_s7  ;;  %s579_s12 = sshll.u32 %s713_s30, 4  ;;  %s580_s12 = int_to_ptr.vmem [resolvable:$false] %s579_s12 }
  0x2e   : > { %s581_s20 = scalar_lea.vmem %s580_s12, 256  ;;  %p582_p12 = scmp.lt.s32.totalorder %s841_s25, %s580_s12 }
  0x2f   : > { %p577_p8 = pnand %p575_p3, %p561_p6  ;;  %p583_p10 = scmp.lt.s32.totalorder %s581_s20, %s574_s7 }
  0x31   : > { %p578_p2 = pneg %p577_p8  ;;  %p584_p11 = por %p583_p10, %p582_p12 }
  0x33   : > { %p585_p13 = pnand %p584_p11, %p578_p2 }
  0x35   : > { %588 = shalt.err (!%p585_p13)
}
  0x36   : > { %446 = dma.hbm_to_vmem [thread:$0]  (!%p836_p4), %s846_s23, 128, %s841_s25, %s136_s26  }
  0x37   : > { %p153_p5 = scmp.lt.s32.totalorder %s711_s19, 7  ;;  %p990_p9 = scmp.ge.s32.totalorder %s711_s19, 1 }
  0x39   : > { %p154_p6 = pnand %p990_p9, %p153_p5 }
  0x3a   : > { %s159_s8 = sand.u32 (!%p154_p6), 1, %s687_s13  }
  0x3b   : > { %157 = sbr.rel (%p154_p6) target bundleno = 1445 (0x5a5), region = 28  ;;  %s878_s24 = sshll.u32 (!%p154_p6), %s159_s8, 3 }
  0x3c   : > { %s160_s21 = scalar_lea.sflag (!%p154_p6), [#allocation6], %s159_s8  ;;  %s163_s27 = scalar_lea.vmem (!%p154_p6), [#allocation5], %s878_s24 }
  0x42   : > { %662 = dma.done.wait (%p807_p7), %s160_s21, 128  }
  0x43   : > { %664 = vsyncadd (%p807_p7), %s160_s21, 4294967168  ;;  %s185_s23 = sand.u32 1, %s675_s10   ;;  %p188_p12 = scmp.lt.s32.totalorder %s699_s16, 1 }
  0x44   : > { %s889_s25 = sshll.u32 %s185_s23, 3  ;;  %p428_p2 = scmp.ne.s32.totalorder %s695_s15, 0 }
  0x45   : > { %s189_s29 = scalar_select %p188_p12, %s699_s16, 1 }
  0x46   : > { %s187_s20 = scalar_lea.vmem [#allocation8], %s889_s25  ;;  %195 = sbr.rel (%p428_p2) target bundleno = 376 (0x178), region = 36  ;;  %vm197_vm0 = vcmask (!%p428_p2), 31744   ;;  %vm207_vm1 = vcmask (!%p428_p2), 7168  }
  0x47   : > { %s427_s26 = sshll.u32 %s189_s29, 3 }
  0x48   : > { %s191_s12 = scalar_lea.vmem %s979_s0, %s427_s26 }
  0x49   : > { %v196_v0 = vld [vmem:[%s191_s12] sm:$0xff] (!%p428_p2) }
  0x4a   : > { %v198_v1 = vsel (!%p428_p2), %vm197_vm0, %v196_v0, -inf  ;;  %v210_v2 = vsel (!%p428_p2), %vm197_vm0, %v196_v0, 0.0 }
  0x4b   : > { %199 = vmax.xlane.f32.xlu0 (!%p428_p2), %v198_v1  ;;  %211 = vadd.xlane.f32.xlu1 (!%p428_p2), %v210_v2 }
  0xd8   : > { %v200_v3 = vpop.xlane.xlu0 %199  ;;  %v212_v8 = vpop.xlane.xlu1 %211 }
  0xd9   : > { %v201_v4 = vsub.f32 %v196_v0, %v200_v3  ;;  %208 = vst.msk [vmem:[#allocation2] sm:$0xff] %vm207_vm1, %v200_v3  ;;  %213 = vst.msk [vmem:[#allocation4] sm:$0xff] %vm207_vm1, %v212_v8 }
  0xdb   : > { %v202_v5 = vmul.f32 1.442695, %v201_v4 }
  0xdd   : > { %544 = vpow2.f32 %v202_v5 }
  0xe7   : > { %v545_v6 = vpop.eup %544 }
  0xe8   : > { %v204_v7 = vsel %vm197_vm0, %v545_v6, 0.0 }
  0xe9   : > { %205 = vadd.xlane.f32.xlu0 %v204_v7 }
 0x176   : > { %v206_v9 = vpop.xlane.xlu0 %205 }
 0x177   : > { %209 = vst.msk [vmem:[#allocation3] sm:$0xff] %vm207_vm1, %v206_v9 }
 0x178 PF: > { %v214_v10 = vld [vmem:[%s163_s27] sm:$0xff]  ;;  %p429_p7 = scmp.ne.s32.totalorder %s695_s15, 2 }
 0x179   : > { %v219_v11 = vlaneseq (!%p429_p7)  ;;  %s430_s28 = sshll.u32 (!%p429_p7), %s695_s15, 7  ;;  %v714_v16 = vmov (!%p429_p7), 0   ;;  %v228_v17 = vld [vmem:[#allocation2] sm:$0xff] (!%p429_p7)  ;;  %vm247_vm3 = vcmask (!%p429_p7), 7168  }
 0x17a   : > { %218 = sbr.rel (%p429_p7) target bundleno = 818 (0x332), region = 40  ;;  %v222_v12 = vstv (!%p429_p7), %s430_s28  ;;  %546 = vset.pattern.permute.xlu0 (!%p429_p7), %v714_v16 }
 0x17b   : > { %v220_v13 = vand.u32 (!%p429_p7), 127, %v219_v11 }
 0x17d   : > { %v223_v14 = vadd.s32 (!%p429_p7), %v222_v12, %v220_v13 }
 0x17e   : > { %v242_v28 = vld [vmem:[#allocation3] sm:$0xff] (!%p429_p7) }
 0x17f   : > { %vm224_vm2 = vcmp.lt.s32.totalorder (!%p429_p7), %v223_v14, 300 }
 0x180   : > { %v225_v15 = vsel (!%p429_p7), %vm224_vm2, %v214_v10, -inf }
 0x181   : > { %226 = vmax.xlane.f32.xlu0 %v225_v15 }
 0x20e   : > { %v227_v18 = vpop.xlane.xlu0 %226 }
 0x20f   : > { %v229_v19 = vmax.f32 %v228_v17, %v227_v18 }
 0x211   : > { %v239_v20 = vsub.f32 %v228_v17, %v229_v19  ;;  %249 = vst.msk [vmem:[#allocation2] sm:$0xff] %vm247_vm3, %v229_v19  ;;  %232 = vperm.xlu0 %546, %v229_v19  }
 0x213   : > { %v240_v26 = vmul.f32 1.442695, %v239_v20 }
 0x290   : > { %v233_v21 = vpop.permute.xlu0 %232 }
 0x291   : > { %v235_v22 = vsub.f32 %v214_v10, %v233_v21 }
 0x293   : > { %v236_v23 = vmul.f32 1.442695, %v235_v22 }
 0x295   : > { %547 = vpow2.f32 %v236_v23 }
 0x296   : > { %549 = vpow2.f32 %v240_v26 }
 0x29f   : > { %v548_v24 = vpop.eup %547 }
 0x2a0   : > { %v238_v25 = vsel %vm224_vm2, %v548_v24, 0.0  ;;  %v550_v27 = vpop.eup %549 }
 0x2a1   : > { %244 = vadd.xlane.f32.xlu1 %v238_v25  ;;  %v243_v29 = vmul.f32 %v550_v27, %v242_v28 }
 0x32e   : > { %v245_v30 = vpop.xlane.xlu1 %244 }
 0x32f   : > { %v246_v31 = vadd.f32 %v245_v30, %v243_v29 }
 0x331   : > { %248 = vst.msk [vmem:[#allocation3] sm:$0xff] %vm247_vm3, %v246_v31 }
 0x332 PF: > { %p431_p4 = scmp.eq.s32.totalorder %s695_s15, 2 }
 0x333   : > { %254 = vmax.xlane.f32.xlu0 (!%p431_p4), %v214_v10  ;;  %v715_v32 = vmov (!%p431_p4), 0   ;;  %v256_v33 = vld [vmem:[#allocation2] sm:$0xff] (!%p431_p4)  ;;  %vm274_vm4 = vcmask (!%p431_p4), 7168  }
 0x334   : > { %253 = sbr.rel (%p431_p4) target bundleno = 1251 (0x4e3), region = 44  ;;  %551 = vset.pattern.permute.xlu0 (!%p431_p4), %v715_v32 }
 0x338   : > { %v269_v43 = vld [vmem:[#allocation3] sm:$0xff] (!%p431_p4) }
 0x3c0   : > { %v255_v34 = vpop.xlane.xlu0 %254 }
 0x3c1   : > { %v257_v35 = vmax.f32 %v256_v33, %v255_v34 }
 0x3c3   : > { %v266_v36 = vsub.f32 %v256_v33, %v257_v35  ;;  %276 = vst.msk [vmem:[#allocation2] sm:$0xff] %vm274_vm4, %v257_v35  ;;  %260 = vperm.xlu0 %551, %v257_v35  }
 0x3c5   : > { %v267_v41 = vmul.f32 1.442695, %v266_v36 }
 0x442   : > { %v261_v37 = vpop.permute.xlu0 %260 }
 0x443   : > { %v263_v38 = vsub.f32 %v214_v10, %v261_v37 }
 0x445   : > { %v264_v39 = vmul.f32 1.442695, %v263_v38 }
 0x447   : > { %552 = vpow2.f32 %v264_v39 }
 0x448   : > { %554 = vpow2.f32 %v267_v41 }
 0x451   : > { %v553_v40 = vpop.eup %552 }
 0x452   : > { %271 = vadd.xlane.f32.xlu1 %v553_v40  ;;  %v555_v42 = vpop.eup %554 }
 0x453   : > { %v270_v44 = vmul.f32 %v555_v42, %v269_v43 }
 0x4df   : > { %v272_v45 = vpop.xlane.xlu1 %271 }
 0x4e0   : > { %v273_v46 = vadd.f32 %v272_v45, %v270_v44 }
 0x4e2   : > { %275 = vst.msk [vmem:[#allocation3] sm:$0xff] %vm274_vm4, %v273_v46 }
 0x4e3 PF: > { %279 = sbr.rel (%p429_p7) target bundleno = 1420 (0x58c), region = 48  ;;  %v716_v48 = vmov (!%p429_p7), 0   ;;  %v288_v49 = vlaneseq (!%p429_p7)  ;;  %s433_s8 = sshll.u32 (!%p429_p7), %s699_s16, 3  ;;  %v280_v53 = vld [vmem:[#allocation2] sm:$0xff] (!%p429_p7)  ;;  %v286_v57 = vld [vmem:[#allocation4] sm:$0xff] (!%p429_p7)  ;;  %vm295_vm6 = vcmask (!%p429_p7), 7168  }
 0x4e4   : > { %556 = vset.pattern.permute.xlu0 (!%p429_p7), %v716_v48  ;;  %v291_v51 = vstv (!%p429_p7), %s433_s8 }
 0x4e5   : > { %v289_v50 = vshrl.u32 (!%p429_p7), %v288_v49, 7 }
 0x4e7   : > { %v292_v55 = vadd.s32 (!%p429_p7), %v291_v51, %v289_v50 }
 0x4e9   : > { %v281_v47 = vld [vmem:[#allocation3] sm:$0xff] (!%p429_p7)  ;;  %vm293_vm5 = vcmp.lt.s32.totalorder (!%p429_p7), %v292_v55, 12 }
 0x4ea   : > { %557 = vlog2.f32 %v281_v47 }
 0x4f4   : > { %v558_v52 = vpop.eup %557 }
 0x4f5   : > { %v283_v54 = vmul.f32 0.6931472, %v558_v52 }
 0x4f7   : > { %v284_v56 = vadd.f32 %v283_v54, %v280_v53 }
 0x4f9   : > { %v285_v58 = vmul.f32 4.0, %v284_v56 }
 0x4fb   : > { %v287_v59 = vsub.f32 %v285_v58, %v286_v57 }
 0x4fd   : > { %v294_v60 = vsel %vm293_vm5, %v287_v59, 0.0 }
 0x4fe   : > { %v296_v61 = vsel %vm295_vm6, %v294_v60, 0.0 }
 0x4ff   : > { %v297_v62 = vrot.slane %v296_v61, 4 }
 0x501   : > { %v298_v63 = vadd.f32 %v297_v62, %v296_v61 }
 0x503   : > { %v299_v0 = vrot.slane %v298_v63, 2 }
 0x505   : > { %v300_v1 = vadd.f32 %v299_v0, %v298_v63 }
 0x507   : > { %v301_v2 = vrot.slane %v300_v1, 1 }
 0x509   : > { %v302_v3 = vadd.f32 %v301_v2, %v300_v1 }
 0x50b   : > { %305 = vperm.xlu0 %556, %v302_v3  }
 0x58a   : > { %v306_v4 = vpop.permute.xlu0 %305 }
 0x58b   : > { %308 = vst [vmem:[%s187_s20] sm:$0xff] %v306_v4 }
 0x58c PF: > { %s435_s15 = sshll.u32 %s699_s16, 7  ;;  %s323_s29 = sshll.u32 %s187_s20, 4  ;;  %s324_s29 = int_to_ptr.vmem [resolvable:$true] %s323_s29 }
 0x58d   : > { %s919_s27 = scalar_lea.hbm %s981_s2, %s435_s15  ;;  %s310_s26 = scalar_lea.sflag [#allocation7], %s185_s23 }
 0x58e   : > { %s589_s7 = scalar_lea.vmem %s324_s29, 128  ;;  %p991_p1 = scmp.ne.s32.totalorder %s987_s3, 0 }
 0x58f   : > { %p590_p0 = scmp.ne.s32.totalorder %s324_s29, %s589_s7  ;;  %s717_s30 = smov [#allocation8]  }
 0x590   : > { %s593_s12 = sshll.u32 %s717_s30, 4  ;;  %s594_s12 = int_to_ptr.vmem [resolvable:$false] %s593_s12 }
 0x591   : > { %p591_p3 = pnand %p590_p0, %p991_p1  ;;  %s595_s28 = scalar_lea.vmem %s594_s12, 256 }
 0x592   : > { %p596_p10 = scmp.lt.s32.totalorder %s324_s29, %s594_s12  ;;  %p597_p11 = scmp.lt.s32.totalorder %s595_s28, %s589_s7 }
 0x593   : > { %p592_p8 = pneg %p591_p3 }
 0x594   : > { %p598_p13 = por %p597_p11, %p596_p10 }
 0x596   : > { %p599_p5 = pnand %p598_p13, %p592_p8 }
 0x598   : > { %602 = shalt.err (!%p599_p5)
}
 0x599   : > { %s603_s16 = scalar_lea.hbm %s919_s27, 128  ;;  %s607_s20 = scalar_lea.hbm %s981_s2, 256 }
 0x59a   : > { %p604_p9 = scmp.ne.s32.totalorder %s919_s27, %s603_s16  ;;  %p608_p2 = scmp.lt.u32.totalorder %s919_s27, %s981_s2 }
 0x59b   : > { %p609_p7 = scmp.lt.u32.totalorder %s607_s20, %s603_s16  ;;  %p611_p0 = scmp.lt.u32.totalorder %s603_s16, %s919_s27 }
 0x59c   : > { %p605_p6 = pnand %p604_p9, %p991_p1 }
 0x59d   : > { %p610_p4 = por %p609_p7, %p608_p2 }
 0x59e   : > { %p606_p12 = pneg %p605_p6 }
 0x59f   : > { %p612_p3 = por %p611_p0, %p610_p4 }
 0x5a1   : > { %p613_p8 = pnand %p612_p3, %p606_p12 }
 0x5a3   : > { %616 = shalt.err (!%p613_p8)
}
 0x5a4   : > { %441 = dma.vmem_to_hbm [thread:$0]  (%p991_p1), %s324_s29, 128, %s919_s27, %s310_s26  }
 0x5a5 PF: > { %p452_p10 = scmp.ge.s32.totalorder %s711_s19, 2  ;;  %s335_s24 = sand.u32 1, %s671_s9  }
 0x5a6   : > { %p992_p11 = scmp.ne.s32.totalorder %s988_s6, 0  ;;  %s336_s21 = scalar_lea.sflag [#allocation7], %s335_s24 }
 0x5a8   : > { %p448_p13 = pnand %p452_p10, %p992_p11 }
 0x5aa   : > { %666 = dma.done.wait (!%p448_p13), %s336_s21, 128  }
 0x5ab   : > { %668 = vsyncadd (!%p448_p13), %s336_s21, 4294967168  ;;  %s18_s19 = sadd.s32 1, %s711_s19   ;;  %s993_s3 = sld [smem:[#allocation11_spill]] }
 0x5ac   : > { %p15_p5 = scmp.ge.s32.totalorder %s18_s19, 8   ;;  %s994_s9 = smov %s675_s10 }
 0x5ad   : > { %s995_s10 = smov %s679_s11  ;;  %s996_s11 = smov %s820_s4 }
 0x5ae   : > { %s997_s12 = smov %s687_s13  ;;  %s998_s13 = smov %s691_s14 }
 0x5af   : > { %s999_s14 = smov %s823_s5  ;;  %s1000_s15 = smov %s703_s17 }
 0x5b0   : > { %s1001_s16 = smov %s707_s18  ;;  %s1002_s17 = smov %s1005_s22 }
 0x5b1   : > { %s1003_s18 = smov %s993_s3  ;;  %17 = sbr.rel (!%p15_p5) target bundleno = 9 (0x9), region = 92 }
 0x5b8   :  { %341 = vsyncpa [#allocation6], 1 }
 0x5b9   :  { %343 = vsyncpa [#allocation6 + $0x1], 1 }
 0x5ba   :  { %344 = vsyncpa [#allocation7], 1 }
 0x5bb   :  { %346 = vsyncpa [#allocation7 + $0x1], 1 }

</bundles_post_ra>
